<compile_context>
chip_gen: v7x
topology: tpu7x:2x2x1
jax: 0.10.0
libtpu: 0.0.40
codegen_flags: <defaults>
</compile_context>

<pallas_src>
import jax
import jax.numpy as jnp
from jax.experimental import pallas as pl
from jax.experimental.pallas import tpu as pltpu


def clip_embedding_kernel(tok_ref, table_ref, pos_ref, out_ref, rows_ref, sems):
    # tok_ref:   (B, T_pad) int32 in SMEM   -- scalar-prefetched token ids
    # table_ref: (V, D) HBM ref             -- gathered row-by-row via DMA
    # pos_ref:   (tt, D) VMEM block         -- position-embedding tile
    # out_ref:   (1, tt, D) output block
    # rows_ref:  (tt, D) VMEM scratch for gathered embedding rows
    # sems:      (tt,) DMA semaphores
    b = pl.program_id(0)
    t = pl.program_id(1)
    tt = rows_ref.shape[0]
    base = t * tt

    # Issue one row DMA per token in the tile; all descriptors are in flight
    # at once so the DMA engine overlaps the small row transfers.  Then wait
    # for all and do the position-embedding add on the VPU.
    copies = []
    for r in range(tt):                              # static unroll (tt <= 128)
        tok = tok_ref[b, base + r]                   # scalar read from SMEM
        cp = pltpu.make_async_copy(
            table_ref.at[pl.ds(tok, 1)],             # (1, D) row of HBM table
            rows_ref.at[pl.ds(r, 1)],
            sems.at[r])
        cp.start()
        copies.append(cp)
    for cp in copies:
        cp.wait()

    out_ref[...] = (rows_ref[...] + pos_ref[...])[None].astype(out_ref.dtype)


def clip_embedding(tokens, token_embedding, position_embedding, *, tt=None):
    """tokens: (B, T) int; token_embedding: (V, D); position_embedding: (T, D)."""
    B, T = tokens.shape
    V, D = token_embedding.shape
    assert position_embedding.shape == (T, D)

    if tt is None:
        # Tokens per grid step: multiple of 8 sublanes; cover the whole token
        # axis in one tile when possible (CLIP T=77 -> tt=80, single tile per
        # batch element), capped at 128 to bound the static DMA unroll / VMEM.
        tt = min(128, 8 * pl.cdiv(T, 8))
    T_pad = tt * pl.cdiv(T, tt)

    # Clamp ids (an out-of-range id would otherwise be an OOB DMA read) and
    # pad the token axis so the token-tile grid divides evenly; padded rows
    # gather row 0 and are sliced off below.
    tok = jnp.clip(tokens.astype(jnp.int32), 0, V - 1)
    tok = jnp.pad(tok, ((0, 0), (0, T_pad - T)))
    pos = jnp.pad(position_embedding, ((0, T_pad - T), (0, 0)))

    out = pl.pallas_call(
        clip_embedding_kernel,
        out_shape=jax.ShapeDtypeStruct((B, T_pad, D), token_embedding.dtype),
        grid_spec=pltpu.PrefetchScalarGridSpec(
            num_scalar_prefetch=1,                       # token ids -> SMEM
            grid=(B, T_pad // tt),
            in_specs=[
                pl.BlockSpec(memory_space=pl.ANY),                # table in HBM
                pl.BlockSpec((tt, D), lambda b, t, tok: (t, 0)),  # pos tile
            ],
            out_specs=pl.BlockSpec((1, tt, D), lambda b, t, tok: (b, t, 0)),
            scratch_shapes=[
                pltpu.VMEM((tt, D), token_embedding.dtype),
                pltpu.SemaphoreType.DMA((tt,)),
            ]),
        compiler_params=pltpu.CompilerParams(
            dimension_semantics=("parallel", "parallel")),
    )(tok, token_embedding, pos)

    return out[:, :T, :]


if __name__ == "__main__":
    # Small shapes consistent with CLIPEmbedding(n_vocab, n_embd, n_token).
    n_vocab, n_embd, n_token = 64, 32, 8
    batch = 2

    key = jax.random.PRNGKey(0)
    k_tok, k_table, k_pos = jax.random.split(key, 3)

    tokens = jax.random.randint(k_tok, (batch, n_token), 0, n_vocab, dtype=jnp.int32)
    # nn.Embedding default init ~ N(0, 1); position_embedding is zeros in the
    # torch module, but use small random values so the add path is exercised.
    token_embedding = jax.random.normal(k_table, (n_vocab, n_embd), dtype=jnp.float32)
    position_embedding = 0.02 * jax.random.normal(k_pos, (n_token, n_embd),
                                                  dtype=jnp.float32)

    out = clip_embedding(tokens, token_embedding, position_embedding)
    out = jax.block_until_ready(out)

    # Pure-JAX reference: x = table[tokens] + pos
    ref = token_embedding[tokens] + position_embedding[None, :, :]
    assert out.shape == (batch, n_token, n_embd)
    assert jnp.allclose(out, ref, atol=1e-5, rtol=1e-5), "mismatch vs reference"

    print("KERNEL_OK")
</pallas_src>

<mosaic_0001>
module attributes {stable_mosaic.version = 11 : i64} {
  func.func @clip_embedding_kernel(%arg0: i32, %arg1: i32, %arg2: memref<2x8xi32, #tpu.memory_space<smem>>, %arg3: memref<64x32xf32, #tpu.memory_space<any>>, %arg4: memref<8x32xf32, #tpu.memory_space<vmem>>, %arg5: memref<1x8x32xf32, #tpu.memory_space<vmem>>, %arg6: memref<8x32xf32, #tpu.memory_space<vmem>>, %arg7: memref<8x!tpu.dma_semaphore, #tpu.memory_space<semaphore_mem>>) attributes {dimension_semantics = [#tpu.dimension_semantics<parallel>, #tpu.dimension_semantics<parallel>], iteration_bounds = array<i64: 2, 1>, scalar_prefetch = 1 : i64, scratch_operands = 2 : i64, tpu.core_type = #tpu.core_type<tc>, window_params = [{}, {transform_indices = @transform_1, window_bounds = array<i64: 8, 32>}, {transform_indices = @transform_2, window_bounds = array<i64: 1, 8, 32>}]} {
    %c8_i32 = arith.constant 8 : i32
    %0 = arith.muli %arg1, %c8_i32 : i32
    %c0_i32 = arith.constant 0 : i32
    %1 = arith.addi %0, %c0_i32 : i32
    %2 = arith.index_cast %arg0 : i32 to index
    %3 = arith.index_cast %1 : i32 to index
    %4 = memref.load %arg2[%2, %3] : memref<2x8xi32, #tpu.memory_space<smem>>
    %c0_i32_0 = arith.constant 0 : i32
    %c0_i32_1 = arith.constant 0 : i32
    %5 = tpu.memref_slice %arg3[%4, %c0_i32_1] : memref<64x32xf32, #tpu.memory_space<any>> -> memref<1x32xf32, #tpu.memory_space<any>>
    %c0_i32_2 = arith.constant 0 : i32
    %c0_i32_3 = arith.constant 0 : i32
    %6 = tpu.memref_slice %arg6[%c0_i32_2, %c0_i32_3] : memref<8x32xf32, #tpu.memory_space<vmem>> -> memref<1x32xf32, #tpu.memory_space<vmem>>
    %7 = tpu.memref_slice %arg7[%c0_i32_0] : memref<8x!tpu.dma_semaphore, #tpu.memory_space<semaphore_mem>> -> memref<1x!tpu.dma_semaphore, #tpu.memory_space<semaphore_mem>>
    %8 = tpu.memref_squeeze %7 : memref<1x!tpu.dma_semaphore, #tpu.memory_space<semaphore_mem>> -> memref<!tpu.dma_semaphore, #tpu.memory_space<semaphore_mem>>
    tpu.enqueue_dma source(%5 : memref<1x32xf32, #tpu.memory_space<any>>) target(%6 : memref<1x32xf32, #tpu.memory_space<vmem>>) target_semaphore(%8 : memref<!tpu.dma_semaphore, #tpu.memory_space<semaphore_mem>>)
    %c1_i32 = arith.constant 1 : i32
    %9 = arith.addi %0, %c1_i32 : i32
    %10 = arith.index_cast %arg0 : i32 to index
    %11 = arith.index_cast %9 : i32 to index
    %12 = memref.load %arg2[%10, %11] : memref<2x8xi32, #tpu.memory_space<smem>>
    %c1_i32_4 = arith.constant 1 : i32
    %c0_i32_5 = arith.constant 0 : i32
    %13 = tpu.memref_slice %arg3[%12, %c0_i32_5] : memref<64x32xf32, #tpu.memory_space<any>> -> memref<1x32xf32, #tpu.memory_space<any>>
    %c1_i32_6 = arith.constant 1 : i32
    %c0_i32_7 = arith.constant 0 : i32
    %14 = tpu.memref_slice %arg6[%c1_i32_6, %c0_i32_7] : memref<8x32xf32, #tpu.memory_space<vmem>> -> memref<1x32xf32, #tpu.memory_space<vmem>>
    %15 = tpu.memref_slice %arg7[%c1_i32_4] : memref<8x!tpu.dma_semaphore, #tpu.memory_space<semaphore_mem>> -> memref<1x!tpu.dma_semaphore, #tpu.memory_space<semaphore_mem>>
    %16 = tpu.memref_squeeze %15 : memref<1x!tpu.dma_semaphore, #tpu.memory_space<semaphore_mem>> -> memref<!tpu.dma_semaphore, #tpu.memory_space<semaphore_mem>>
    tpu.enqueue_dma source(%13 : memref<1x32xf32, #tpu.memory_space<any>>) target(%14 : memref<1x32xf32, #tpu.memory_space<vmem>>) target_semaphore(%16 : memref<!tpu.dma_semaphore, #tpu.memory_space<semaphore_mem>>)
    %c2_i32 = arith.constant 2 : i32
    %17 = arith.addi %0, %c2_i32 : i32
    %18 = arith.index_cast %arg0 : i32 to index
    %19 = arith.index_cast %17 : i32 to index
    %20 = memref.load %arg2[%18, %19] : memref<2x8xi32, #tpu.memory_space<smem>>
    %c2_i32_8 = arith.constant 2 : i32
    %c0_i32_9 = arith.constant 0 : i32
    %21 = tpu.memref_slice %arg3[%20, %c0_i32_9] : memref<64x32xf32, #tpu.memory_space<any>> -> memref<1x32xf32, #tpu.memory_space<any>>
    %c2_i32_10 = arith.constant 2 : i32
    %c0_i32_11 = arith.constant 0 : i32
    %22 = tpu.memref_slice %arg6[%c2_i32_10, %c0_i32_11] : memref<8x32xf32, #tpu.memory_space<vmem>> -> memref<1x32xf32, #tpu.memory_space<vmem>>
    %23 = tpu.memref_slice %arg7[%c2_i32_8] : memref<8x!tpu.dma_semaphore, #tpu.memory_space<semaphore_mem>> -> memref<1x!tpu.dma_semaphore, #tpu.memory_space<semaphore_mem>>
    %24 = tpu.memref_squeeze %23 : memref<1x!tpu.dma_semaphore, #tpu.memory_space<semaphore_mem>> -> memref<!tpu.dma_semaphore, #tpu.memory_space<semaphore_mem>>
    tpu.enqueue_dma source(%21 : memref<1x32xf32, #tpu.memory_space<any>>) target(%22 : memref<1x32xf32, #tpu.memory_space<vmem>>) target_semaphore(%24 : memref<!tpu.dma_semaphore, #tpu.memory_space<semaphore_mem>>)
    %c3_i32 = arith.constant 3 : i32
    %25 = arith.addi %0, %c3_i32 : i32
    %26 = arith.index_cast %arg0 : i32 to index
    %27 = arith.index_cast %25 : i32 to index
    %28 = memref.load %arg2[%26, %27] : memref<2x8xi32, #tpu.memory_space<smem>>
    %c3_i32_12 = arith.constant 3 : i32
    %c0_i32_13 = arith.constant 0 : i32
    %29 = tpu.memref_slice %arg3[%28, %c0_i32_13] : memref<64x32xf32, #tpu.memory_space<any>> -> memref<1x32xf32, #tpu.memory_space<any>>
    %c3_i32_14 = arith.constant 3 : i32
    %c0_i32_15 = arith.constant 0 : i32
    %30 = tpu.memref_slice %arg6[%c3_i32_14, %c0_i32_15] : memref<8x32xf32, #tpu.memory_space<vmem>> -> memref<1x32xf32, #tpu.memory_space<vmem>>
    %31 = tpu.memref_slice %arg7[%c3_i32_12] : memref<8x!tpu.dma_semaphore, #tpu.memory_space<semaphore_mem>> -> memref<1x!tpu.dma_semaphore, #tpu.memory_space<semaphore_mem>>
    %32 = tpu.memref_squeeze %31 : memref<1x!tpu.dma_semaphore, #tpu.memory_space<semaphore_mem>> -> memref<!tpu.dma_semaphore, #tpu.memory_space<semaphore_mem>>
    tpu.enqueue_dma source(%29 : memref<1x32xf32, #tpu.memory_space<any>>) target(%30 : memref<1x32xf32, #tpu.memory_space<vmem>>) target_semaphore(%32 : memref<!tpu.dma_semaphore, #tpu.memory_space<semaphore_mem>>)
    %c4_i32 = arith.constant 4 : i32
    %33 = arith.addi %0, %c4_i32 : i32
    %34 = arith.index_cast %arg0 : i32 to index
    %35 = arith.index_cast %33 : i32 to index
    %36 = memref.load %arg2[%34, %35] : memref<2x8xi32, #tpu.memory_space<smem>>
    %c4_i32_16 = arith.constant 4 : i32
    %c0_i32_17 = arith.constant 0 : i32
    %37 = tpu.memref_slice %arg3[%36, %c0_i32_17] : memref<64x32xf32, #tpu.memory_space<any>> -> memref<1x32xf32, #tpu.memory_space<any>>
    %c4_i32_18 = arith.constant 4 : i32
    %c0_i32_19 = arith.constant 0 : i32
    %38 = tpu.memref_slice %arg6[%c4_i32_18, %c0_i32_19] : memref<8x32xf32, #tpu.memory_space<vmem>> -> memref<1x32xf32, #tpu.memory_space<vmem>>
    %39 = tpu.memref_slice %arg7[%c4_i32_16] : memref<8x!tpu.dma_semaphore, #tpu.memory_space<semaphore_mem>> -> memref<1x!tpu.dma_semaphore, #tpu.memory_space<semaphore_mem>>
    %40 = tpu.memref_squeeze %39 : memref<1x!tpu.dma_semaphore, #tpu.memory_space<semaphore_mem>> -> memref<!tpu.dma_semaphore, #tpu.memory_space<semaphore_mem>>
    tpu.enqueue_dma source(%37 : memref<1x32xf32, #tpu.memory_space<any>>) target(%38 : memref<1x32xf32, #tpu.memory_space<vmem>>) target_semaphore(%40 : memref<!tpu.dma_semaphore, #tpu.memory_space<semaphore_mem>>)
    %c5_i32 = arith.constant 5 : i32
    %41 = arith.addi %0, %c5_i32 : i32
    %42 = arith.index_cast %arg0 : i32 to index
    %43 = arith.index_cast %41 : i32 to index
    %44 = memref.load %arg2[%42, %43] : memref<2x8xi32, #tpu.memory_space<smem>>
    %c5_i32_20 = arith.constant 5 : i32
    %c0_i32_21 = arith.constant 0 : i32
    %45 = tpu.memref_slice %arg3[%44, %c0_i32_21] : memref<64x32xf32, #tpu.memory_space<any>> -> memref<1x32xf32, #tpu.memory_space<any>>
    %c5_i32_22 = arith.constant 5 : i32
    %c0_i32_23 = arith.constant 0 : i32
    %46 = tpu.memref_slice %arg6[%c5_i32_22, %c0_i32_23] : memref<8x32xf32, #tpu.memory_space<vmem>> -> memref<1x32xf32, #tpu.memory_space<vmem>>
    %47 = tpu.memref_slice %arg7[%c5_i32_20] : memref<8x!tpu.dma_semaphore, #tpu.memory_space<semaphore_mem>> -> memref<1x!tpu.dma_semaphore, #tpu.memory_space<semaphore_mem>>
    %48 = tpu.memref_squeeze %47 : memref<1x!tpu.dma_semaphore, #tpu.memory_space<semaphore_mem>> -> memref<!tpu.dma_semaphore, #tpu.memory_space<semaphore_mem>>
    tpu.enqueue_dma source(%45 : memref<1x32xf32, #tpu.memory_space<any>>) target(%46 : memref<1x32xf32, #tpu.memory_space<vmem>>) target_semaphore(%48 : memref<!tpu.dma_semaphore, #tpu.memory_space<semaphore_mem>>)
    %c6_i32 = arith.constant 6 : i32
    %49 = arith.addi %0, %c6_i32 : i32
    %50 = arith.index_cast %arg0 : i32 to index
    %51 = arith.index_cast %49 : i32 to index
    %52 = memref.load %arg2[%50, %51] : memref<2x8xi32, #tpu.memory_space<smem>>
    %c6_i32_24 = arith.constant 6 : i32
    %c0_i32_25 = arith.constant 0 : i32
    %53 = tpu.memref_slice %arg3[%52, %c0_i32_25] : memref<64x32xf32, #tpu.memory_space<any>> -> memref<1x32xf32, #tpu.memory_space<any>>
    %c6_i32_26 = arith.constant 6 : i32
    %c0_i32_27 = arith.constant 0 : i32
    %54 = tpu.memref_slice %arg6[%c6_i32_26, %c0_i32_27] : memref<8x32xf32, #tpu.memory_space<vmem>> -> memref<1x32xf32, #tpu.memory_space<vmem>>
    %55 = tpu.memref_slice %arg7[%c6_i32_24] : memref<8x!tpu.dma_semaphore, #tpu.memory_space<semaphore_mem>> -> memref<1x!tpu.dma_semaphore, #tpu.memory_space<semaphore_mem>>
    %56 = tpu.memref_squeeze %55 : memref<1x!tpu.dma_semaphore, #tpu.memory_space<semaphore_mem>> -> memref<!tpu.dma_semaphore, #tpu.memory_space<semaphore_mem>>
    tpu.enqueue_dma source(%53 : memref<1x32xf32, #tpu.memory_space<any>>) target(%54 : memref<1x32xf32, #tpu.memory_space<vmem>>) target_semaphore(%56 : memref<!tpu.dma_semaphore, #tpu.memory_space<semaphore_mem>>)
    %c7_i32 = arith.constant 7 : i32
    %57 = arith.addi %0, %c7_i32 : i32
    %58 = arith.index_cast %arg0 : i32 to index
    %59 = arith.index_cast %57 : i32 to index
    %60 = memref.load %arg2[%58, %59] : memref<2x8xi32, #tpu.memory_space<smem>>
    %c7_i32_28 = arith.constant 7 : i32
    %c0_i32_29 = arith.constant 0 : i32
    %61 = tpu.memref_slice %arg3[%60, %c0_i32_29] : memref<64x32xf32, #tpu.memory_space<any>> -> memref<1x32xf32, #tpu.memory_space<any>>
    %c7_i32_30 = arith.constant 7 : i32
    %c0_i32_31 = arith.constant 0 : i32
    %62 = tpu.memref_slice %arg6[%c7_i32_30, %c0_i32_31] : memref<8x32xf32, #tpu.memory_space<vmem>> -> memref<1x32xf32, #tpu.memory_space<vmem>>
    %63 = tpu.memref_slice %arg7[%c7_i32_28] : memref<8x!tpu.dma_semaphore, #tpu.memory_space<semaphore_mem>> -> memref<1x!tpu.dma_semaphore, #tpu.memory_space<semaphore_mem>>
    %64 = tpu.memref_squeeze %63 : memref<1x!tpu.dma_semaphore, #tpu.memory_space<semaphore_mem>> -> memref<!tpu.dma_semaphore, #tpu.memory_space<semaphore_mem>>
    tpu.enqueue_dma source(%61 : memref<1x32xf32, #tpu.memory_space<any>>) target(%62 : memref<1x32xf32, #tpu.memory_space<vmem>>) target_semaphore(%64 : memref<!tpu.dma_semaphore, #tpu.memory_space<semaphore_mem>>)
    %c0_i32_32 = arith.constant 0 : i32
    %c0_i32_33 = arith.constant 0 : i32
    %65 = tpu.memref_slice %arg3[%4, %c0_i32_33] : memref<64x32xf32, #tpu.memory_space<any>> -> memref<1x32xf32, #tpu.memory_space<any>>
    %c0_i32_34 = arith.constant 0 : i32
    %c0_i32_35 = arith.constant 0 : i32
    %66 = tpu.memref_slice %arg6[%c0_i32_34, %c0_i32_35] : memref<8x32xf32, #tpu.memory_space<vmem>> -> memref<1x32xf32, #tpu.memory_space<vmem>>
    %67 = tpu.memref_slice %arg7[%c0_i32_32] : memref<8x!tpu.dma_semaphore, #tpu.memory_space<semaphore_mem>> -> memref<1x!tpu.dma_semaphore, #tpu.memory_space<semaphore_mem>>
    %68 = tpu.memref_squeeze %67 : memref<1x!tpu.dma_semaphore, #tpu.memory_space<semaphore_mem>> -> memref<!tpu.dma_semaphore, #tpu.memory_space<semaphore_mem>>
    tpu.wait_dma2 semaphore(%68 : memref<!tpu.dma_semaphore, #tpu.memory_space<semaphore_mem>>) src(%65 : memref<1x32xf32, #tpu.memory_space<any>>) dst(%66 : memref<1x32xf32, #tpu.memory_space<vmem>>)
    %c1_i32_36 = arith.constant 1 : i32
    %c0_i32_37 = arith.constant 0 : i32
    %69 = tpu.memref_slice %arg3[%12, %c0_i32_37] : memref<64x32xf32, #tpu.memory_space<any>> -> memref<1x32xf32, #tpu.memory_space<any>>
    %c1_i32_38 = arith.constant 1 : i32
    %c0_i32_39 = arith.constant 0 : i32
    %70 = tpu.memref_slice %arg6[%c1_i32_38, %c0_i32_39] : memref<8x32xf32, #tpu.memory_space<vmem>> -> memref<1x32xf32, #tpu.memory_space<vmem>>
    %71 = tpu.memref_slice %arg7[%c1_i32_36] : memref<8x!tpu.dma_semaphore, #tpu.memory_space<semaphore_mem>> -> memref<1x!tpu.dma_semaphore, #tpu.memory_space<semaphore_mem>>
    %72 = tpu.memref_squeeze %71 : memref<1x!tpu.dma_semaphore, #tpu.memory_space<semaphore_mem>> -> memref<!tpu.dma_semaphore, #tpu.memory_space<semaphore_mem>>
    tpu.wait_dma2 semaphore(%72 : memref<!tpu.dma_semaphore, #tpu.memory_space<semaphore_mem>>) src(%69 : memref<1x32xf32, #tpu.memory_space<any>>) dst(%70 : memref<1x32xf32, #tpu.memory_space<vmem>>)
    %c2_i32_40 = arith.constant 2 : i32
    %c0_i32_41 = arith.constant 0 : i32
    %73 = tpu.memref_slice %arg3[%20, %c0_i32_41] : memref<64x32xf32, #tpu.memory_space<any>> -> memref<1x32xf32, #tpu.memory_space<any>>
    %c2_i32_42 = arith.constant 2 : i32
    %c0_i32_43 = arith.constant 0 : i32
    %74 = tpu.memref_slice %arg6[%c2_i32_42, %c0_i32_43] : memref<8x32xf32, #tpu.memory_space<vmem>> -> memref<1x32xf32, #tpu.memory_space<vmem>>
    %75 = tpu.memref_slice %arg7[%c2_i32_40] : memref<8x!tpu.dma_semaphore, #tpu.memory_space<semaphore_mem>> -> memref<1x!tpu.dma_semaphore, #tpu.memory_space<semaphore_mem>>
    %76 = tpu.memref_squeeze %75 : memref<1x!tpu.dma_semaphore, #tpu.memory_space<semaphore_mem>> -> memref<!tpu.dma_semaphore, #tpu.memory_space<semaphore_mem>>
    tpu.wait_dma2 semaphore(%76 : memref<!tpu.dma_semaphore, #tpu.memory_space<semaphore_mem>>) src(%73 : memref<1x32xf32, #tpu.memory_space<any>>) dst(%74 : memref<1x32xf32, #tpu.memory_space<vmem>>)
    %c3_i32_44 = arith.constant 3 : i32
    %c0_i32_45 = arith.constant 0 : i32
    %77 = tpu.memref_slice %arg3[%28, %c0_i32_45] : memref<64x32xf32, #tpu.memory_space<any>> -> memref<1x32xf32, #tpu.memory_space<any>>
    %c3_i32_46 = arith.constant 3 : i32
    %c0_i32_47 = arith.constant 0 : i32
    %78 = tpu.memref_slice %arg6[%c3_i32_46, %c0_i32_47] : memref<8x32xf32, #tpu.memory_space<vmem>> -> memref<1x32xf32, #tpu.memory_space<vmem>>
    %79 = tpu.memref_slice %arg7[%c3_i32_44] : memref<8x!tpu.dma_semaphore, #tpu.memory_space<semaphore_mem>> -> memref<1x!tpu.dma_semaphore, #tpu.memory_space<semaphore_mem>>
    %80 = tpu.memref_squeeze %79 : memref<1x!tpu.dma_semaphore, #tpu.memory_space<semaphore_mem>> -> memref<!tpu.dma_semaphore, #tpu.memory_space<semaphore_mem>>
    tpu.wait_dma2 semaphore(%80 : memref<!tpu.dma_semaphore, #tpu.memory_space<semaphore_mem>>) src(%77 : memref<1x32xf32, #tpu.memory_space<any>>) dst(%78 : memref<1x32xf32, #tpu.memory_space<vmem>>)
    %c4_i32_48 = arith.constant 4 : i32
    %c0_i32_49 = arith.constant 0 : i32
    %81 = tpu.memref_slice %arg3[%36, %c0_i32_49] : memref<64x32xf32, #tpu.memory_space<any>> -> memref<1x32xf32, #tpu.memory_space<any>>
    %c4_i32_50 = arith.constant 4 : i32
    %c0_i32_51 = arith.constant 0 : i32
    %82 = tpu.memref_slice %arg6[%c4_i32_50, %c0_i32_51] : memref<8x32xf32, #tpu.memory_space<vmem>> -> memref<1x32xf32, #tpu.memory_space<vmem>>
    %83 = tpu.memref_slice %arg7[%c4_i32_48] : memref<8x!tpu.dma_semaphore, #tpu.memory_space<semaphore_mem>> -> memref<1x!tpu.dma_semaphore, #tpu.memory_space<semaphore_mem>>
    %84 = tpu.memref_squeeze %83 : memref<1x!tpu.dma_semaphore, #tpu.memory_space<semaphore_mem>> -> memref<!tpu.dma_semaphore, #tpu.memory_space<semaphore_mem>>
    tpu.wait_dma2 semaphore(%84 : memref<!tpu.dma_semaphore, #tpu.memory_space<semaphore_mem>>) src(%81 : memref<1x32xf32, #tpu.memory_space<any>>) dst(%82 : memref<1x32xf32, #tpu.memory_space<vmem>>)
    %c5_i32_52 = arith.constant 5 : i32
    %c0_i32_53 = arith.constant 0 : i32
    %85 = tpu.memref_slice %arg3[%44, %c0_i32_53] : memref<64x32xf32, #tpu.memory_space<any>> -> memref<1x32xf32, #tpu.memory_space<any>>
    %c5_i32_54 = arith.constant 5 : i32
    %c0_i32_55 = arith.constant 0 : i32
    %86 = tpu.memref_slice %arg6[%c5_i32_54, %c0_i32_55] : memref<8x32xf32, #tpu.memory_space<vmem>> -> memref<1x32xf32, #tpu.memory_space<vmem>>
    %87 = tpu.memref_slice %arg7[%c5_i32_52] : memref<8x!tpu.dma_semaphore, #tpu.memory_space<semaphore_mem>> -> memref<1x!tpu.dma_semaphore, #tpu.memory_space<semaphore_mem>>
    %88 = tpu.memref_squeeze %87 : memref<1x!tpu.dma_semaphore, #tpu.memory_space<semaphore_mem>> -> memref<!tpu.dma_semaphore, #tpu.memory_space<semaphore_mem>>
    tpu.wait_dma2 semaphore(%88 : memref<!tpu.dma_semaphore, #tpu.memory_space<semaphore_mem>>) src(%85 : memref<1x32xf32, #tpu.memory_space<any>>) dst(%86 : memref<1x32xf32, #tpu.memory_space<vmem>>)
    %c6_i32_56 = arith.constant 6 : i32
    %c0_i32_57 = arith.constant 0 : i32
    %89 = tpu.memref_slice %arg3[%52, %c0_i32_57] : memref<64x32xf32, #tpu.memory_space<any>> -> memref<1x32xf32, #tpu.memory_space<any>>
    %c6_i32_58 = arith.constant 6 : i32
    %c0_i32_59 = arith.constant 0 : i32
    %90 = tpu.memref_slice %arg6[%c6_i32_58, %c0_i32_59] : memref<8x32xf32, #tpu.memory_space<vmem>> -> memref<1x32xf32, #tpu.memory_space<vmem>>
    %91 = tpu.memref_slice %arg7[%c6_i32_56] : memref<8x!tpu.dma_semaphore, #tpu.memory_space<semaphore_mem>> -> memref<1x!tpu.dma_semaphore, #tpu.memory_space<semaphore_mem>>
    %92 = tpu.memref_squeeze %91 : memref<1x!tpu.dma_semaphore, #tpu.memory_space<semaphore_mem>> -> memref<!tpu.dma_semaphore, #tpu.memory_space<semaphore_mem>>
    tpu.wait_dma2 semaphore(%92 : memref<!tpu.dma_semaphore, #tpu.memory_space<semaphore_mem>>) src(%89 : memref<1x32xf32, #tpu.memory_space<any>>) dst(%90 : memref<1x32xf32, #tpu.memory_space<vmem>>)
    %c7_i32_60 = arith.constant 7 : i32
    %c0_i32_61 = arith.constant 0 : i32
    %93 = tpu.memref_slice %arg3[%60, %c0_i32_61] : memref<64x32xf32, #tpu.memory_space<any>> -> memref<1x32xf32, #tpu.memory_space<any>>
    %c7_i32_62 = arith.constant 7 : i32
    %c0_i32_63 = arith.constant 0 : i32
    %94 = tpu.memref_slice %arg6[%c7_i32_62, %c0_i32_63] : memref<8x32xf32, #tpu.memory_space<vmem>> -> memref<1x32xf32, #tpu.memory_space<vmem>>
    %95 = tpu.memref_slice %arg7[%c7_i32_60] : memref<8x!tpu.dma_semaphore, #tpu.memory_space<semaphore_mem>> -> memref<1x!tpu.dma_semaphore, #tpu.memory_space<semaphore_mem>>
    %96 = tpu.memref_squeeze %95 : memref<1x!tpu.dma_semaphore, #tpu.memory_space<semaphore_mem>> -> memref<!tpu.dma_semaphore, #tpu.memory_space<semaphore_mem>>
    tpu.wait_dma2 semaphore(%96 : memref<!tpu.dma_semaphore, #tpu.memory_space<semaphore_mem>>) src(%93 : memref<1x32xf32, #tpu.memory_space<any>>) dst(%94 : memref<1x32xf32, #tpu.memory_space<vmem>>)
    %c0 = arith.constant 0 : index
    %c0_64 = arith.constant 0 : index
    %97 = vector.load %arg6[%c0, %c0_64] : memref<8x32xf32, #tpu.memory_space<vmem>>, vector<8x32xf32>
    %c0_65 = arith.constant 0 : index
    %c0_66 = arith.constant 0 : index
    %98 = vector.load %arg4[%c0_65, %c0_66] : memref<8x32xf32, #tpu.memory_space<vmem>>, vector<8x32xf32>
    %99 = arith.addf %97, %98 : vector<8x32xf32>
    %100 = vector.shape_cast %99 : vector<8x32xf32> to vector<1x8x32xf32>
    %c0_67 = arith.constant 0 : index
    %c0_68 = arith.constant 0 : index
    %c0_69 = arith.constant 0 : index
    %101 = vector.load %arg5[%c0_67, %c0_68, %c0_69] : memref<1x8x32xf32, #tpu.memory_space<vmem>>, vector<1x8x32xf32>
    tpu.vector_store %arg5[%c0_67, %c0_68, %c0_69], %100 {strides = array<i32>} : memref<1x8x32xf32, #tpu.memory_space<vmem>>, vector<1x8x32xf32>,
    return
  }
  func.func @transform_1(%arg0: i32, %arg1: i32, %arg2: memref<2x8xi32, #tpu.memory_space<smem>>) -> (i32, i32) {
    %c0_i32 = arith.constant 0 : i32
    %c0_i32_0 = arith.constant 0 : i32
    return %arg1, %c0_i32 : i32, i32
  }
  func.func @transform_2(%arg0: i32, %arg1: i32, %arg2: memref<2x8xi32, #tpu.memory_space<smem>>) -> (i32, i32, i32) {
    %c0_i32 = arith.constant 0 : i32
    %c0_i32_0 = arith.constant 0 : i32
    return %arg0, %arg1, %c0_i32 : i32, i32, i32
  }
}

</mosaic_0001>

<bundles_post_ra>
// kernel: tpu_custom_call.1
= control target key start
LH: loop header
LB: loop body
LE: loop exit
PB: predicated region body
PF: predicated region fallthrough
CT: control target
= control target key end

     0   :  { %s1208_s0 = inlined_call_operand.vmem [shape: s32[2,8], index: 0, kind: input, shape index: {}]   ;;  %s1209_s1 = inlined_call_operand.vmem [shape: f32[64,32], index: 1, kind: input, shape index: {}]   ;;  %s1210_s2 = inlined_call_operand.vmem [shape: f32[8,32], index: 2, kind: input, shape index: {}]   ;;  %s1211_s3 = inlined_call_operand.hbm [shape: f32[2,8,32], index: 3, kind: output, shape index: {}]  }
   0x1   :  { %s8_s14 = sshll.u32 %s1208_s0, 4  ;;  %s9_s14 = int_to_ptr.vmem [resolvable:$true] %s8_s14 }
   0x2   :  { %s920_s15 = scalar_lea.vmem %s9_s14, 32  ;;  %p925_p1 = scmp.lt.s32.totalorder %s9_s14, %s9_s14 }
   0x3   :  { %p921_p0 = scmp.ne.s32.totalorder %s9_s14, %s920_s15  ;;  %p926_p2 = scmp.lt.s32.totalorder %s920_s15, %s920_s15 }
   0x5   :  { %p927_p3 = por %p926_p2, %p925_p1 }
   0x7   :  { %p928_p4 = pnand %p927_p3, %p921_p0 }
   0x9   :  { %931 = shalt.err (!%p928_p4)  }
   0xa   :  { %s1030_s16 = smov [#allocation5]  }
   0xb   :  { %11 = dma.vmem_to_smem %s9_s14, 32, %s1030_s16, [#allocation4] }
   0xc   :  { %984 = dma.done.wait [#allocation4], 32 }
   0xd   :  { %985 = vsyncadd [#allocation4], 4294967264 }
   0xe   :  { %13 = sfence }
   0xf   :  { %14 = vsyncpa [#allocation7], 0 }
  0x10   :  { %16 = vsyncpa [#allocation7 + $0x1], 0  ;;  %s1055_s17 = smov 0   ;;  %s1057_s18 = smov 0  }
  0x11   :  { %s1059_s0 = smov 0   ;;  %s1061_s19 = smov 0  }
  0x12   :  { %s1063_s20 = smov 0   ;;  %s1065_s21 = smov 0  }
  0x13 LB: > { %s838_s22 = sadd.s32 4294967295, %s1028_s21   ;;  %s839_s23 = sadd.s32 4294967294, %s1028_s21   ;;  %s1028_s21 = sphi %s1065_s21, %s22_s21   ;;  %s1024_s20 = sphi %s1063_s20, %s1218_s20   ;;  %s1020_s19 = sphi %s1061_s19, %s1217_s19   ;;  %s1016_s0 = sphi %s1059_s0, %s1216_s0   ;;  %s1012_s18 = sphi %s1057_s18, %s1215_s18   ;;  %s1008_s17 = sphi %s1055_s17, %s1214_s17  }
  0x14   : > { %s34_s24 = sadd.s32 1, %s1024_s20  ;;  %s69_s25 = sadd.s32 1, %s1016_s0 }
  0x15   : > { %p36_p5 = scmp.ge.s32.totalorder %s34_s24, 2  ;;  %p79_p6 = scmp.ne.s32.totalorder %s1016_s0, %s1012_s18 }
  0x16   : > { %p80_p7 = scmp.eq.s32.totalorder %s838_s22, 1  ;;  %p85_p8 = scmp.ne.s32.totalorder %s1012_s18, %s1008_s17 }
  0x17   : > { %s1220_s24 = smov (%p36_p5, %s34_s24), 0  ;;  %p86_p10 = scmp.eq.s32.totalorder %s839_s23, 1 }
  0x18   : > { %p1093_p9 = por %p80_p7, %p79_p6  ;;  %s64_s27 = ssub.s32 %s1024_s20, %s1220_s24 }
  0x19   : > { %p842_p11 = scmp.ge.s32.totalorder %s1028_s21, 1  ;;  %p67_p12 = scmp.eq.s32.totalorder %s64_s27, 0 }
  0x1a   : > { %p1100_p13 = por %p86_p10, %p85_p8  ;;  %p111_p0 = scmp.lt.s32.totalorder %s1028_s21, 3 }
  0x1b   : > { %s1106_s29 = scalar_select %p67_p12, %s1016_s0, %s69_s25  }
  0x1c   : > { %p112_p1 = pnand %p842_p11, %p111_p0 }
  0x1d   : > { %s127_s30 = sand.u32 (!%p112_p1), 1, %s1012_s18   ;;  %s1109_s4 = sshll.u32 (!%p112_p1), %s1020_s19, 7 }
  0x1e   : > { %115 = sbr.rel (%p112_p1) target bundleno = 150 (0x96), region = 24  ;;  %s1113_s5 = sshll.u32 (!%p112_p1), %s127_s30, 3 }
  0x1f   : > { %s142_s6 = sld [smem:[#allocation5 + %s1109_s4]] (!%p112_p1)  ;;  %s129_s10 = scalar_lea.vmem (!%p112_p1), [#allocation6], %s1113_s5 }
  0x25   : > { %s143_s9 = scalar_lea.vmem %s1209_s1, %s142_s6 }
  0x26   : > { %v161_v0 = vld [vmem:[%s143_s9] sm:$0x1] }
  0x27   : > { %162 = vst [vmem:[#allocation2] sm:$0x1] %v161_v0 }
  0x28   : > { %187 = vsyncadd [#allocation3], 16  ;;  %s195_s11 = sadd.s32 1, %s1109_s4 }
  0x29   : > { %s196_s12 = sld [smem:[#allocation5 + %s195_s11]] }
  0x2f   : > { %s197_s15 = scalar_lea.vmem %s1209_s1, %s196_s12 }
  0x30   : > { %v217_v1 = vld [vmem:[%s197_s15] sm:$0x1] }
  0x31   : > { %218 = vst [vmem:[#allocation2 + $0x1] sm:$0x1] %v217_v1 }
  0x32   : > { %243 = vsyncadd [#allocation3 + $0x1], 16  ;;  %s251_s16 = sadd.s32 2, %s1109_s4 }
  0x33   : > { %s252_s19 = sld [smem:[#allocation5 + %s251_s16]] }
  0x39   : > { %s253_s25 = scalar_lea.vmem %s1209_s1, %s252_s19 }
  0x3a   : > { %v273_v2 = vld [vmem:[%s253_s25] sm:$0x1] }
  0x3b   : > { %274 = vst [vmem:[#allocation2 + $0x2] sm:$0x1] %v273_v2 }
  0x3c   : > { %299 = vsyncadd [#allocation3 + $0x2], 16  ;;  %s307_s27 = sadd.s32 3, %s1109_s4 }
  0x3d   : > { %s308_s6 = sld [smem:[#allocation5 + %s307_s27]] }
  0x43   : > { %s309_s9 = scalar_lea.vmem %s1209_s1, %s308_s6 }
  0x44   : > { %v329_v3 = vld [vmem:[%s309_s9] sm:$0x1] }
  0x45   : > { %330 = vst [vmem:[#allocation2 + $0x3] sm:$0x1] %v329_v3 }
  0x46   : > { %355 = vsyncadd [#allocation3 + $0x3], 16  ;;  %s363_s11 = sadd.s32 4, %s1109_s4 }
  0x47   : > { %s364_s12 = sld [smem:[#allocation5 + %s363_s11]] }
  0x4d   : > { %s365_s15 = scalar_lea.vmem %s1209_s1, %s364_s12 }
  0x4e   : > { %v385_v4 = vld [vmem:[%s365_s15] sm:$0x1] }
  0x4f   : > { %386 = vst [vmem:[#allocation2 + $0x4] sm:$0x1] %v385_v4 }
  0x50   : > { %411 = vsyncadd [#allocation3 + $0x4], 16  ;;  %s419_s16 = sadd.s32 5, %s1109_s4 }
  0x51   : > { %s420_s19 = sld [smem:[#allocation5 + %s419_s16]] }
  0x57   : > { %s421_s25 = scalar_lea.vmem %s1209_s1, %s420_s19 }
  0x58   : > { %v441_v5 = vld [vmem:[%s421_s25] sm:$0x1] }
  0x59   : > { %442 = vst [vmem:[#allocation2 + $0x5] sm:$0x1] %v441_v5 }
  0x5a   : > { %467 = vsyncadd [#allocation3 + $0x5], 16  ;;  %s475_s27 = sadd.s32 6, %s1109_s4 }
  0x5b   : > { %s476_s6 = sld [smem:[#allocation5 + %s475_s27]] }
  0x61   : > { %s477_s9 = scalar_lea.vmem %s1209_s1, %s476_s6 }
  0x62   : > { %v497_v6 = vld [vmem:[%s477_s9] sm:$0x1] }
  0x63   : > { %498 = vst [vmem:[#allocation2 + $0x6] sm:$0x1] %v497_v6 }
  0x64   : > { %523 = vsyncadd [#allocation3 + $0x6], 16  ;;  %s531_s11 = sadd.s32 7, %s1109_s4 }
  0x65   : > { %s532_s12 = sld [smem:[#allocation5 + %s531_s11]] }
  0x6b   : > { %s533_s15 = scalar_lea.vmem %s1209_s1, %s532_s12 }
  0x6c   : > { %v553_v7 = vld [vmem:[%s533_s15] sm:$0x1] }
  0x6d   : > { %554 = vst [vmem:[#allocation2 + $0x7] sm:$0x1] %v553_v7 }
  0x6e   : > { %579 = vsyncadd [#allocation3 + $0x7], 16 }
  0x6f   : > { %986 = dma.done.wait [#allocation3], 16 }
  0x70   : > { %987 = vsyncadd [#allocation3], 4294967280 }
  0x71   : > { %988 = dma.done.wait [#allocation3 + $0x1], 16 }
  0x72   : > { %989 = vsyncadd [#allocation3 + $0x1], 4294967280 }
  0x73   : > { %990 = dma.done.wait [#allocation3 + $0x2], 16 }
  0x74   : > { %991 = vsyncadd [#allocation3 + $0x2], 4294967280 }
  0x75   : > { %992 = dma.done.wait [#allocation3 + $0x3], 16 }
  0x76   : > { %993 = vsyncadd [#allocation3 + $0x3], 4294967280 }
  0x77   : > { %994 = dma.done.wait [#allocation3 + $0x4], 16 }
  0x78   : > { %995 = vsyncadd [#allocation3 + $0x4], 4294967280 }
  0x79   : > { %996 = dma.done.wait [#allocation3 + $0x5], 16 }
  0x7a   : > { %997 = vsyncadd [#allocation3 + $0x5], 4294967280 }
  0x7b   : > { %998 = dma.done.wait [#allocation3 + $0x6], 16 }
  0x7c   : > { %999 = vsyncadd [#allocation3 + $0x6], 4294967280 }
  0x7d   : > { %1000 = dma.done.wait [#allocation3 + $0x7], 16 }
  0x7e   : > { %1001 = vsyncadd [#allocation3 + $0x7], 4294967280  ;;  %s617_s16 = sshll.u32 %s129_s10, 4  ;;  %v597_v8 = vld [vmem:[#allocation2] sm:$0xff]  ;;  %vm600_vm0 = vcmask 261120   ;;  %s1157_s27 = scalar_lea.hbm %s1211_s3, %s1109_s4  ;;  %s1159_s16 = int_to_ptr.vmem [resolvable:$true] %s617_s16 }
  0x7f   : > { %v598_v9 = vld [vmem:[%s1210_s2] sm:$0xff]  ;;  %s603_s6 = scalar_lea.sflag [#allocation7], %s127_s30  ;;  %s932_s7 = scalar_lea.vmem %s1159_s16, 128 }
  0x80   : > { %v599_v10 = vadd.f32 %v598_v9, %v597_v8  ;;  %p933_p2 = scmp.ne.s32.totalorder %s1159_s16, %s932_s7  ;;  %s1031_s8 = smov [#allocation6]  }
  0x81   : > { %s936_s9 = sshll.u32 %s1031_s8, 4  ;;  %s937_s9 = int_to_ptr.vmem [resolvable:$false] %s936_s9 }
  0x82   : > { %601 = vst.msk [vmem:[%s129_s10] sm:$0xff] %vm600_vm0, %v599_v10  ;;  %p934_p3 = pnand %p933_p2, %p1093_p9  ;;  %s938_s11 = scalar_lea.vmem %s937_s9, 256 }
  0x83   : > { %p939_p5 = scmp.lt.s32.totalorder %s1159_s16, %s937_s9  ;;  %p940_p6 = scmp.lt.s32.totalorder %s938_s11, %s932_s7 }
  0x84   : > { %p935_p4 = pneg %p934_p3 }
  0x85   : > { %p941_p7 = por %p940_p6, %p939_p5 }
  0x87   : > { %p942_p8 = pnand %p941_p7, %p935_p4 }
  0x89   : > { %945 = shalt.err (!%p942_p8)
}
  0x8a   : > { %s946_s30 = scalar_lea.hbm %s1157_s27, 128  ;;  %s950_s10 = scalar_lea.hbm %s1211_s3, 256 }
  0x8b   : > { %p947_p10 = scmp.ne.s32.totalorder %s1157_s27, %s946_s30  ;;  %p951_p0 = scmp.lt.u32.totalorder %s1157_s27, %s1211_s3 }
  0x8c   : > { %p952_p1 = scmp.lt.u32.totalorder %s950_s10, %s946_s30  ;;  %p954_p3 = scmp.lt.u32.totalorder %s946_s30, %s1157_s27 }
  0x8d   : > { %p948_p11 = pnand %p947_p10, %p1093_p9 }
  0x8e   : > { %p953_p2 = por %p952_p1, %p951_p0 }
  0x8f   : > { %p949_p12 = pneg %p948_p11 }
  0x90   : > { %p955_p4 = por %p954_p3, %p953_p2 }
  0x92   : > { %p956_p5 = pnand %p955_p4, %p949_p12 }
  0x94   : > { %959 = shalt.err (!%p956_p5)
}
  0x95   : > { %864 = dma.vmem_to_hbm [thread:$0]  (%p1093_p9), %s1159_s16, 128, %s1157_s27, %s603_s6  }
  0x96 PF: > { %p870_p6 = scmp.ge.s32.totalorder %s1028_s21, 2  ;;  %s629_s14 = sand.u32 1, %s1008_s17  }
  0x97   : > { %s630_s15 = scalar_lea.sflag [#allocation7], %s629_s14 }
  0x98   : > { %p867_p7 = pnand %p870_p6, %p1100_p13 }
  0x9a   : > { %1003 = dma.done.wait (!%p867_p7), %s630_s15, 128  }
  0x9b   : > { %1005 = vsyncadd (!%p867_p7), %s630_s15, 4294967168  ;;  %s22_s21 = sadd.s32 1, %s1028_s21   ;;  %s1214_s17 = smov %s1012_s18 }
  0x9c   : > { %p19_p8 = scmp.ge.s32.totalorder %s22_s21, 4   ;;  %s1215_s18 = smov %s1016_s0 }
  0x9d   : > { %s1216_s0 = smov %s1106_s29  ;;  %s1217_s19 = smov %s1024_s20 }
  0x9e   : > { %s1218_s20 = smov %s1220_s24  ;;  %21 = sbr.rel (!%p19_p8) target bundleno = 19 (0x13), region = 408 }
  0xa5   :  { %635 = vsyncpa [#allocation7], 1 }
  0xa6   :  { %637 = vsyncpa [#allocation7 + $0x1], 1 }
  0xa7   :  { %638 = vsyncmov [#allocation3] }
  0xaa   :  { %s639_s26 = vpop.sfrf %638 }
  0xab   :  { %p856_p9 = scmp.ne.s32.totalorder %s639_s26, 0 }
  0xad   :  { %643 = shalt.err (%p856_p9)  }
  0xae   :  { %645 = vsyncmov [#allocation3 + $0x1] }
  0xb1   :  { %s646_s28 = vpop.sfrf %645 }
  0xb2   :  { %p857_p13 = scmp.ne.s32.totalorder %s646_s28, 0 }
  0xb4   :  { %650 = shalt.err (%p857_p13)  }
  0xb5   :  { %652 = vsyncmov [#allocation3 + $0x2] }
  0xb8   :  { %s653_s16 = vpop.sfrf %652 }
  0xb9   :  { %p858_p10 = scmp.ne.s32.totalorder %s653_s16, 0 }
  0xbb   :  { %657 = shalt.err (%p858_p10)  }
  0xbc   :  { %659 = vsyncmov [#allocation3 + $0x3] }
  0xbf   :  { %s660_s29 = vpop.sfrf %659 }
  0xc0   :  { %p859_p11 = scmp.ne.s32.totalorder %s660_s29, 0 }
  0xc2   :  { %664 = shalt.err (%p859_p11)  }
  0xc3   :  { %666 = vsyncmov [#allocation3 + $0x4] }
  0xc6   :  { %s667_s21 = vpop.sfrf %666 }
  0xc7   :  { %p860_p12 = scmp.ne.s32.totalorder %s667_s21, 0 }
  0xc9   :  { %671 = shalt.err (%p860_p12)  }
  0xca   :  { %673 = vsyncmov [#allocation3 + $0x5] }
  0xcd   :  { %s674_s1 = vpop.sfrf %673 }
  0xce   :  { %p861_p0 = scmp.ne.s32.totalorder %s674_s1, 0 }
  0xd0   :  { %678 = shalt.err (%p861_p0)  }
  0xd1   :  { %680 = vsyncmov [#allocation3 + $0x6] }
  0xd4   :  { %s681_s2 = vpop.sfrf %680 }
  0xd5   :  { %p862_p1 = scmp.ne.s32.totalorder %s681_s2, 0 }
  0xd7   :  { %685 = shalt.err (%p862_p1)  }
  0xd8   :  { %687 = vsyncmov [#allocation3 + $0x7] }
  0xdb   :  { %s688_s3 = vpop.sfrf %687 }
  0xdc   :  { %p863_p2 = scmp.ne.s32.totalorder %s688_s3, 0 }
  0xde   :  { %692 = shalt.err (%p863_p2)  }

</bundles_post_ra>
